<compile_context>
chip_gen: v6e
topology: v6e:2x2x1
jax: 0.10.0
libtpu: 0.0.40
codegen_flags: <defaults>
</compile_context>

<pallas_src>
import functools
import math

import jax
import jax.numpy as jnp
from jax import lax
from jax.experimental import pallas as pl
from jax.experimental.pallas import tpu as pltpu

LN2 = math.log(2.0)
_INV_SQRT2 = 1.0 / math.sqrt(2.0)
MAX_ROWS_PER_TILE = 1024          # (1024,128) f32 tile = 512 KiB per input buffer
LIKELIHOOD_EPS = 1e-9             # likelihood lower bound before the log

# Abramowitz & Stegun 7.1.26 erf constants (|abs err| <= 1.5e-7 with exact t)
_ERF_P = 0.3275911
_A1, _A2, _A3, _A4, _A5 = 0.254829592, -0.284496736, 1.421413741, -1.453152027, 1.061405429


def _round_up(x, m):
    return ((x + m - 1) // m) * m


def _fast_recip(x):
    """EUP approximate reciprocal + one Newton-Raphson step (near-f32 accurate, no divide)."""
    r = pl.reciprocal(x, approx=True)
    return r * (2.0 - x * r)


def _erf_tail(az):
    """poly(t)*exp(-az^2): for az >= 0,  erf(az) = 1 - _erf_tail(az)  (A&S 7.1.26)."""
    t = _fast_recip(1.0 + _ERF_P * az)
    poly = ((((_A5 * t + _A4) * t + _A3) * t + _A2) * t + _A1) * t
    return poly * jnp.exp(-az * az)


def _entropy_kernel(x_ref, loc_ref, scale_ref, *out_refs,
                    rows, tiles_per_core, n_valid, needs_mask, emit_lp, skip_clamp,
                    loc_min, loc_max, scale_min, scale_max):
    c = pl.program_id(0)                      # core-split index (parallel)
    t = pl.program_id(2)                      # row-tile index (reduction)
    psum_ref = out_refs[-1]

    # init the per-(core, group) resident (8,128) accumulator at reduction start
    @pl.when(t == 0)
    def _():
        psum_ref[...] = jnp.zeros_like(psum_ref)

    x = x_ref[...].astype(jnp.float32)
    loc = loc_ref[...].astype(jnp.float32)
    scale = scale_ref[...].astype(jnp.float32)
    if not skip_clamp:
        # _normalize_params: ops.lower_bound / ops.upper_bound == clamp in the fwd pass
        loc = jnp.clip(loc, loc_min, loc_max)
        scale = jnp.clip(scale, scale_min, scale_max)

    # NoisyNormal mass P = Phi((0.5-v)/s) - Phi((-0.5-v)/s), v = |x - loc|,
    # computed as one erf difference: P = 0.5*(erf(zu) - erf(zl)),
    # with 1/sqrt(2) folded into 1/s and the always-negative lower erf specialized.
    inv_s = _fast_recip(scale) * _INV_SQRT2
    v = jnp.abs(x - loc)
    zu = (0.5 - v) * inv_s                    # sign varies
    zl_abs = (0.5 + v) * inv_s                # == |zl|;  zl <= 0 always (v >= 0, s > 0)
    pu_eu = _erf_tail(jnp.abs(zu))            # == 1 - erf(|zu|)
    pl_el = _erf_tail(zl_abs)                 # == 1 - erf(|zl|) = 1 + erf(zl)
    erf_u_plus_1 = jnp.where(zu >= 0.0, 2.0 - pu_eu, pu_eu)      # erf(zu) + 1
    prob = 0.5 * (erf_u_plus_1 - pl_el)
    lp = jnp.log(jnp.maximum(prob, LIKELIHOOD_EPS))

    if emit_lp:                               # only in the draw=True specialization
        out_refs[0][...] = lp.astype(out_refs[0].dtype)

    def accum(vals):
        # fold the (rows,128) tile into the tiny resident (8,128) accumulator (VPU adds)
        psum_ref[...] += vals.reshape(rows // 8, 8, 128).sum(axis=0)

    if not needs_mask:
        accum(lp)
    else:
        n_full_rows = n_valid // 128          # python constants
        rem = n_valid % 128
        tile_row0 = (c * tiles_per_core + t) * rows
        is_full = tile_row0 + rows <= n_full_rows

        @pl.when(is_full)                     # interior tiles: no mask cost
        def _():
            accum(lp)

        @pl.when(jnp.logical_not(is_full))    # boundary / padding tiles only
        def _():
            grow = tile_row0 + lax.broadcasted_iota(jnp.int32, (rows, 128), 0)
            if rem == 0:
                mask = grow < n_full_rows
            else:
                lane = lax.broadcasted_iota(jnp.int32, (rows, 128), 1)
                mask = (grow < n_full_rows) | ((grow == n_full_rows) & (lane < rem))
            accum(jnp.where(mask, lp, 0.0))


def _choose_tiling(n_rows, n_groups):
    """rows/tile (mult of 8, <= MAX), padded rows, tiles per core-split, core-split."""
    cs = 1 if n_groups >= 2 else 2            # keep both v7x TCs busy even when groups==1
    tiles = max(1, pl.cdiv(n_rows, cs * MAX_ROWS_PER_TILE))
    rows = _round_up(pl.cdiv(n_rows, cs * tiles), 8)
    return rows, cs * tiles * rows, tiles, cs


def continuous_conditional_entropy_forward(indexes, loc, scale, param_tables,
                                           draw=False, keep_batch=False,
                                           skip_clamp=False, lp_dtype=jnp.float32):
    """Pallas implementation of ContinuousConditionalEntropyModel.forward."""
    shape = indexes.shape
    B = shape[0]
    N = math.prod(shape[1:])

    # If neither per-batch sums nor the log-prob map are needed, flatten batch into
    # the row axis: full-size tiles, fewer grid steps, single resident accumulator.
    per_batch = draw or keep_batch
    G = B if per_batch else 1
    n_valid = N if per_batch else B * N

    R = pl.cdiv(n_valid, 128)
    rows, R_pad, Tc, CS = _choose_tiling(R, G)
    padded = R_pad * 128
    needs_mask = padded != n_valid

    def prep(a, pad_value):
        a2 = a.reshape(G, n_valid)
        if needs_mask:
            a2 = jnp.pad(a2, ((0, 0), (0, padded - n_valid)), constant_values=pad_value)
        return a2.reshape(G, R_pad, 128)

    # Inputs stay in the caller's dtype (pass bf16 to halve HBM bytes on v5e); the
    # cast to f32 happens on the loaded VMEM tile. Scale pads with 1.0 so padded
    # lanes stay finite (their contribution is masked out of psum anyway).
    x3, loc3, sc3 = prep(indexes, 0), prep(loc, 0), prep(scale, 1)

    loc_tab, sc_tab = param_tables["loc"], param_tables["scale"]
    kernel = functools.partial(
        _entropy_kernel,
        rows=rows, tiles_per_core=Tc, n_valid=n_valid, needs_mask=needs_mask,
        emit_lp=draw, skip_clamp=skip_clamp,
        loc_min=float(loc_tab[0]), loc_max=float(loc_tab[-1]),
        scale_min=float(sc_tab[0]), scale_max=float(sc_tab[-1]))

    in_blk = (None, rows, 128)                # kernel sees (rows, 128)

    def in_map(c, b, t):
        return (b, c * Tc + t, 0)

    in_specs = [pl.BlockSpec(in_blk, in_map) for _ in range(3)]

    psum_shape = jax.ShapeDtypeStruct((CS, G, 8, 128), jnp.float32)
    psum_spec = pl.BlockSpec((None, None, 8, 128), lambda c, b, t: (c, b, 0, 0))

    if draw:
        out_shape = (jax.ShapeDtypeStruct((G, R_pad, 128), lp_dtype), psum_shape)
        out_specs = (pl.BlockSpec(in_blk, in_map), psum_spec)
    else:
        out_shape, out_specs = psum_shape, psum_spec

    elems = G * R_pad * 128
    in_bytes = elems * sum(a.dtype.itemsize for a in (x3, loc3, sc3))
    out_bytes = (elems * jnp.dtype(lp_dtype).itemsize if draw else 0) + CS * G * 8 * 128 * 4
    cost = pl.CostEstimate(flops=int(50 * elems), transcendentals=int(6 * elems),
                           bytes_accessed=int(in_bytes + out_bytes))

    out = pl.pallas_call(
        kernel,
        out_shape=out_shape,
        grid_spec=pltpu.PrefetchScalarGridSpec(
            num_scalar_prefetch=0,
            grid=(CS, G, Tc),                 # reduction (row-tile) axis last
            in_specs=in_specs,
            out_specs=out_specs),
        compiler_params=pltpu.CompilerParams(
            dimension_semantics=("parallel", "parallel", "arbitrary")),
        cost_estimate=cost,
    )(x3, loc3, sc3)

    if draw:
        lp_pad, psum = out
        log_probs = lp_pad.reshape(G, padded)[:, :n_valid].reshape(shape)
    else:
        psum = out
        log_probs = None

    if keep_batch:
        bits = jnp.sum(psum, axis=(0, 2, 3)) / -LN2   # torch.sum(lp, dim=(1,2,3)) / -log(2)
    else:
        bits = jnp.sum(psum) / -LN2                   # torch.sum(lp) / -log(2)
    return (bits, log_probs) if draw else bits


# ---------------------------------------------------------------------------------
# Pure-JAX reference: identical math (same A&S erf) but with exact divisions.
# ---------------------------------------------------------------------------------
def _erf_approx_exact(x):
    ax = jnp.abs(x)
    t = 1.0 / (1.0 + _ERF_P * ax)
    poly = ((((_A5 * t + _A4) * t + _A3) * t + _A2) * t + _A1) * t
    y = 1.0 - poly * jnp.exp(-ax * ax)
    return jnp.where(x >= 0.0, y, -y)


def _forward_ref(indexes, loc, scale, param_tables, keep_batch=False):
    loc = jnp.clip(loc, float(param_tables["loc"][0]), float(param_tables["loc"][-1]))
    scale = jnp.clip(scale, float(param_tables["scale"][0]), float(param_tables["scale"][-1]))
    v = jnp.abs(indexes - loc)
    upper = 0.5 * (1.0 + _erf_approx_exact((0.5 - v) / scale * _INV_SQRT2))
    lower = 0.5 * (1.0 + _erf_approx_exact((-0.5 - v) / scale * _INV_SQRT2))
    lp = jnp.log(jnp.maximum(upper - lower, LIKELIHOOD_EPS))
    if keep_batch:
        return jnp.sum(lp, axis=tuple(range(1, lp.ndim))) / -LN2, lp
    return jnp.sum(lp) / -LN2, lp


if __name__ == "__main__":
    # Deterministic parameter tables (the module's __init__ takes these as config).
    param_tables = {
        "loc": jnp.linspace(-4.0, 4.0, 17, dtype=jnp.float32),
        "scale": jnp.exp(jnp.linspace(jnp.log(0.11), jnp.log(16.0), 16)).astype(jnp.float32),
    }

    def make_inputs(key, shape):
        k1, k2, k3 = jax.random.split(key, 3)
        loc = jax.random.normal(k1, shape, jnp.float32)
        scale = jax.random.uniform(k2, shape, jnp.float32, minval=0.5, maxval=2.0)
        noise = jnp.clip(jax.random.normal(k3, shape, jnp.float32), -3.0, 3.0)
        indexes = jnp.round(loc + scale * noise)   # quantized latents inside the support
        return indexes, loc, scale

    key = jax.random.PRNGKey(0)
    k_small, k_odd, k_big = jax.random.split(key, 3)

    # --- small, module-typical shape (aligned; flattened + per-batch paths) ----------
    B, C, H, W = 2, 4, 16, 16
    indexes, loc, scale = make_inputs(k_small, (B, C, H, W))
    bits = continuous_conditional_entropy_forward(indexes, loc, scale, param_tables)
    bits_kb, log_probs = continuous_conditional_entropy_forward(
        indexes, loc, scale, param_tables, draw=True, keep_batch=True)
    jax.block_until_ready((bits, bits_kb, log_probs))

    ref_bits, _ = _forward_ref(indexes, loc, scale, param_tables)
    ref_bits_kb, ref_lp = _forward_ref(indexes, loc, scale, param_tables, keep_batch=True)
    assert jnp.allclose(bits, ref_bits, rtol=1e-2, atol=1.0), (bits, ref_bits)
    assert jnp.allclose(bits_kb, ref_bits_kb, rtol=1e-2, atol=1.0), (bits_kb, ref_bits_kb)
    assert jnp.allclose(log_probs, ref_lp, rtol=5e-3, atol=2e-3)
    assert bits.shape == () and bits_kb.shape == (B,) and log_probs.shape == (B, C, H, W)

    # --- ragged shape (N not a multiple of 128): exercises pad + in-kernel masking ---
    Bo, Co, Ho, Wo = 2, 3, 10, 10
    idx_o, loc_o, sc_o = make_inputs(k_odd, (Bo, Co, Ho, Wo))
    bits_o = continuous_conditional_entropy_forward(idx_o, loc_o, sc_o, param_tables)
    bits_o_kb, lp_o = continuous_conditional_entropy_forward(
        idx_o, loc_o, sc_o, param_tables, draw=True, keep_batch=True)
    jax.block_until_ready((bits_o, bits_o_kb, lp_o))
    ref_bits_o, _ = _forward_ref(idx_o, loc_o, sc_o, param_tables)
    ref_bits_o_kb, ref_lp_o = _forward_ref(idx_o, loc_o, sc_o, param_tables, keep_batch=True)
    assert jnp.allclose(bits_o, ref_bits_o, rtol=1e-2, atol=1.0), (bits_o, ref_bits_o)
    assert jnp.allclose(bits_o_kb, ref_bits_o_kb, rtol=1e-2, atol=1.0)
    assert jnp.allclose(lp_o, ref_lp_o, rtol=5e-3, atol=2e-3)
    assert lp_o.shape == (Bo, Co, Ho, Wo)

    # --- larger shape: multi-row tiles + 2-way core split on the flattened row axis --
    B2, C2, H2, W2 = 1, 32, 64, 64
    idx2, loc2, sc2 = make_inputs(k_big, (B2, C2, H2, W2))
    bits2 = continuous_conditional_entropy_forward(idx2, loc2, sc2, param_tables)
    jax.block_until_ready(bits2)
    ref_bits2, _ = _forward_ref(idx2, loc2, sc2, param_tables)
    assert jnp.allclose(bits2, ref_bits2, rtol=1e-2, atol=2.0), (bits2, ref_bits2)

    print("KERNEL_OK")
</pallas_src>

<mosaic_0001>
module attributes {stable_mosaic.version = 11 : i64} {
  func.func @_entropy_kernel(%arg0: i32, %arg1: i32, %arg2: i32, %arg3: memref<1x8x128xf32, #tpu.memory_space<vmem>>, %arg4: memref<1x8x128xf32, #tpu.memory_space<vmem>>, %arg5: memref<1x8x128xf32, #tpu.memory_space<vmem>>, %arg6: memref<1x1x8x128xf32, #tpu.memory_space<vmem>>) attributes {dimension_semantics = [#tpu.dimension_semantics<parallel>, #tpu.dimension_semantics<parallel>, #tpu.dimension_semantics<arbitrary>], iteration_bounds = array<i64: 2, 1, 1>, scalar_prefetch = 0 : i64, scratch_operands = 0 : i64, tpu.core_type = #tpu.core_type<tc>, window_params = [{transform_indices = @transform_0, window_bounds = array<i64: 1, 8, 128>}, {transform_indices = @transform_1, window_bounds = array<i64: 1, 8, 128>}, {transform_indices = @transform_2, window_bounds = array<i64: 1, 8, 128>}, {transform_indices = @transform_3, window_bounds = array<i64: 1, 1, 8, 128>}]} {
    %c0_i32 = arith.constant 0 : i32
    %0 = arith.cmpi eq, %arg2, %c0_i32 : i32
    %1 = arith.extui %0 : i1 to i32
    %c0_i32_0 = arith.constant 0 : i32
    %2 = arith.cmpi ne, %1, %c0_i32_0 : i32
    scf.if %2 {
      %cst_47 = arith.constant 0.000000e+00 : f32
      %108 = vector.broadcast %cst_47 : f32 to vector<8x128xf32>
      %c0_48 = arith.constant 0 : index
      %c0_49 = arith.constant 0 : index
      %c0_50 = arith.constant 0 : index
      %c0_51 = arith.constant 0 : index
      %109 = vector.load %arg6[%c0_48, %c0_49, %c0_50, %c0_51] : memref<1x1x8x128xf32, #tpu.memory_space<vmem>>, vector<1x1x8x128xf32>
      %110 = vector.shape_cast %109 : vector<1x1x8x128xf32> to vector<8x128xf32>
      %111 = vector.shape_cast %108 : vector<8x128xf32> to vector<1x1x8x128xf32>
      tpu.vector_store %arg6[%c0_48, %c0_49, %c0_50, %c0_51], %111 {strides = array<i32>} : memref<1x1x8x128xf32, #tpu.memory_space<vmem>>, vector<1x1x8x128xf32>,
    } else {
    }
    %c0 = arith.constant 0 : index
    %c0_1 = arith.constant 0 : index
    %c0_2 = arith.constant 0 : index
    %3 = vector.load %arg3[%c0, %c0_1, %c0_2] : memref<1x8x128xf32, #tpu.memory_space<vmem>>, vector<1x8x128xf32>
    %4 = vector.shape_cast %3 : vector<1x8x128xf32> to vector<8x128xf32>
    %c0_3 = arith.constant 0 : index
    %c0_4 = arith.constant 0 : index
    %c0_5 = arith.constant 0 : index
    %5 = vector.load %arg4[%c0_3, %c0_4, %c0_5] : memref<1x8x128xf32, #tpu.memory_space<vmem>>, vector<1x8x128xf32>
    %6 = vector.shape_cast %5 : vector<1x8x128xf32> to vector<8x128xf32>
    %c0_6 = arith.constant 0 : index
    %c0_7 = arith.constant 0 : index
    %c0_8 = arith.constant 0 : index
    %7 = vector.load %arg5[%c0_6, %c0_7, %c0_8] : memref<1x8x128xf32, #tpu.memory_space<vmem>>, vector<1x8x128xf32>
    %8 = vector.shape_cast %7 : vector<1x8x128xf32> to vector<8x128xf32>
    %cst = arith.constant -4.000000e+00 : f32
    %cst_9 = arith.constant 4.000000e+00 : f32
    %9 = vector.broadcast %cst : f32 to vector<8x128xf32>
    %10 = arith.maximumf %9, %6 : vector<8x128xf32>
    %11 = vector.broadcast %cst_9 : f32 to vector<8x128xf32>
    %12 = arith.minimumf %11, %10 : vector<8x128xf32>
    %cst_10 = arith.constant 1.100000e-01 : f32
    %cst_11 = arith.constant 1.600000e+01 : f32
    %13 = vector.broadcast %cst_10 : f32 to vector<8x128xf32>
    %14 = arith.maximumf %13, %8 : vector<8x128xf32>
    %15 = vector.broadcast %cst_11 : f32 to vector<8x128xf32>
    %16 = arith.minimumf %15, %14 : vector<8x128xf32>
    %17 = tpu.reciprocal %16 {approx = true} : vector<8x128xf32> -> vector<8x128xf32>
    %18 = arith.mulf %16, %17 : vector<8x128xf32>
    %cst_12 = arith.constant 2.000000e+00 : f32
    %19 = vector.broadcast %cst_12 : f32 to vector<8x128xf32>
    %20 = arith.subf %19, %18 : vector<8x128xf32>
    %21 = arith.mulf %17, %20 : vector<8x128xf32>
    %cst_13 = arith.constant 0.707106769 : f32
    %22 = vector.broadcast %cst_13 : f32 to vector<8x128xf32>
    %23 = arith.mulf %21, %22 : vector<8x128xf32>
    %24 = arith.subf %4, %12 : vector<8x128xf32>
    %25 = math.absf %24 : vector<8x128xf32>
    %cst_14 = arith.constant 5.000000e-01 : f32
    %26 = vector.broadcast %cst_14 : f32 to vector<8x128xf32>
    %27 = arith.subf %26, %25 : vector<8x128xf32>
    %28 = arith.mulf %27, %23 : vector<8x128xf32>
    %cst_15 = arith.constant 5.000000e-01 : f32
    %29 = vector.broadcast %cst_15 : f32 to vector<8x128xf32>
    %30 = arith.addf %29, %25 : vector<8x128xf32>
    %31 = arith.mulf %30, %23 : vector<8x128xf32>
    %32 = math.absf %28 : vector<8x128xf32>
    %cst_16 = arith.constant 0.327591091 : f32
    %33 = vector.broadcast %cst_16 : f32 to vector<8x128xf32>
    %34 = arith.mulf %33, %32 : vector<8x128xf32>
    %cst_17 = arith.constant 1.000000e+00 : f32
    %35 = vector.broadcast %cst_17 : f32 to vector<8x128xf32>
    %36 = arith.addf %35, %34 : vector<8x128xf32>
    %37 = tpu.reciprocal %36 {approx = true} : vector<8x128xf32> -> vector<8x128xf32>
    %38 = arith.mulf %36, %37 : vector<8x128xf32>
    %cst_18 = arith.constant 2.000000e+00 : f32
    %39 = vector.broadcast %cst_18 : f32 to vector<8x128xf32>
    %40 = arith.subf %39, %38 : vector<8x128xf32>
    %41 = arith.mulf %37, %40 : vector<8x128xf32>
    %cst_19 = arith.constant 1.06140542 : f32
    %42 = vector.broadcast %cst_19 : f32 to vector<8x128xf32>
    %43 = arith.mulf %42, %41 : vector<8x128xf32>
    %cst_20 = arith.constant -1.45315206 : f32
    %44 = vector.broadcast %cst_20 : f32 to vector<8x128xf32>
    %45 = arith.addf %43, %44 : vector<8x128xf32>
    %46 = arith.mulf %45, %41 : vector<8x128xf32>
    %cst_21 = arith.constant 1.42141378 : f32
    %47 = vector.broadcast %cst_21 : f32 to vector<8x128xf32>
    %48 = arith.addf %46, %47 : vector<8x128xf32>
    %49 = arith.mulf %48, %41 : vector<8x128xf32>
    %cst_22 = arith.constant -0.284496725 : f32
    %50 = vector.broadcast %cst_22 : f32 to vector<8x128xf32>
    %51 = arith.addf %49, %50 : vector<8x128xf32>
    %52 = arith.mulf %51, %41 : vector<8x128xf32>
    %cst_23 = arith.constant 0.254829586 : f32
    %53 = vector.broadcast %cst_23 : f32 to vector<8x128xf32>
    %54 = arith.addf %52, %53 : vector<8x128xf32>
    %55 = arith.mulf %54, %41 : vector<8x128xf32>
    %cst_24 = arith.constant 0.000000e+00 : f32
    %56 = vector.broadcast %cst_24 : f32 to vector<8x128xf32>
    %57 = arith.subf %56, %32 : vector<8x128xf32>
    %58 = arith.mulf %57, %32 : vector<8x128xf32>
    %59 = math.exp %58 : vector<8x128xf32>
    %60 = arith.mulf %55, %59 : vector<8x128xf32>
    %cst_25 = arith.constant 0.327591091 : f32
    %61 = vector.broadcast %cst_25 : f32 to vector<8x128xf32>
    %62 = arith.mulf %61, %31 : vector<8x128xf32>
    %cst_26 = arith.constant 1.000000e+00 : f32
    %63 = vector.broadcast %cst_26 : f32 to vector<8x128xf32>
    %64 = arith.addf %63, %62 : vector<8x128xf32>
    %65 = tpu.reciprocal %64 {approx = true} : vector<8x128xf32> -> vector<8x128xf32>
    %66 = arith.mulf %64, %65 : vector<8x128xf32>
    %cst_27 = arith.constant 2.000000e+00 : f32
    %67 = vector.broadcast %cst_27 : f32 to vector<8x128xf32>
    %68 = arith.subf %67, %66 : vector<8x128xf32>
    %69 = arith.mulf %65, %68 : vector<8x128xf32>
    %cst_28 = arith.constant 1.06140542 : f32
    %70 = vector.broadcast %cst_28 : f32 to vector<8x128xf32>
    %71 = arith.mulf %70, %69 : vector<8x128xf32>
    %cst_29 = arith.constant -1.45315206 : f32
    %72 = vector.broadcast %cst_29 : f32 to vector<8x128xf32>
    %73 = arith.addf %71, %72 : vector<8x128xf32>
    %74 = arith.mulf %73, %69 : vector<8x128xf32>
    %cst_30 = arith.constant 1.42141378 : f32
    %75 = vector.broadcast %cst_30 : f32 to vector<8x128xf32>
    %76 = arith.addf %74, %75 : vector<8x128xf32>
    %77 = arith.mulf %76, %69 : vector<8x128xf32>
    %cst_31 = arith.constant -0.284496725 : f32
    %78 = vector.broadcast %cst_31 : f32 to vector<8x128xf32>
    %79 = arith.addf %77, %78 : vector<8x128xf32>
    %80 = arith.mulf %79, %69 : vector<8x128xf32>
    %cst_32 = arith.constant 0.254829586 : f32
    %81 = vector.broadcast %cst_32 : f32 to vector<8x128xf32>
    %82 = arith.addf %80, %81 : vector<8x128xf32>
    %83 = arith.mulf %82, %69 : vector<8x128xf32>
    %cst_33 = arith.constant 0.000000e+00 : f32
    %84 = vector.broadcast %cst_33 : f32 to vector<8x128xf32>
    %85 = arith.subf %84, %31 : vector<8x128xf32>
    %86 = arith.mulf %85, %31 : vector<8x128xf32>
    %87 = math.exp %86 : vector<8x128xf32>
    %88 = arith.mulf %83, %87 : vector<8x128xf32>
    %cst_34 = arith.constant 0.000000e+00 : f32
    %89 = vector.broadcast %cst_34 : f32 to vector<8x128xf32>
    %90 = arith.cmpf oge, %28, %89 : vector<8x128xf32>
    %cst_35 = arith.constant 2.000000e+00 : f32
    %91 = vector.broadcast %cst_35 : f32 to vector<8x128xf32>
    %92 = arith.subf %91, %60 : vector<8x128xf32>
    %93 = arith.select %90, %92, %60 : vector<8x128xi1>, vector<8x128xf32>
    %94 = arith.subf %93, %88 : vector<8x128xf32>
    %cst_36 = arith.constant 5.000000e-01 : f32
    %95 = vector.broadcast %cst_36 : f32 to vector<8x128xf32>
    %96 = arith.mulf %95, %94 : vector<8x128xf32>
    %cst_37 = arith.constant 9.99999971E-10 : f32
    %97 = vector.broadcast %cst_37 : f32 to vector<8x128xf32>
    %98 = arith.maximumf %96, %97 : vector<8x128xf32>
    %99 = math.log %98 : vector<8x128xf32>
    %c0_38 = arith.constant 0 : index
    %c0_39 = arith.constant 0 : index
    %c0_40 = arith.constant 0 : index
    %c0_41 = arith.constant 0 : index
    %100 = vector.load %arg6[%c0_38, %c0_39, %c0_40, %c0_41] : memref<1x1x8x128xf32, #tpu.memory_space<vmem>>, vector<1x1x8x128xf32>
    %101 = vector.shape_cast %100 : vector<1x1x8x128xf32> to vector<8x128xf32>
    %102 = vector.shape_cast %99 : vector<8x128xf32> to vector<1x8x128xf32>
    %cst_42 = arith.constant dense<0.000000e+00> : vector<8x128xf32>
    %103 = vector.multi_reduction <add>, %102, %cst_42 [0] : vector<1x8x128xf32> to vector<8x128xf32>
    %104 = arith.addf %101, %103 : vector<8x128xf32>
    %c0_43 = arith.constant 0 : index
    %c0_44 = arith.constant 0 : index
    %c0_45 = arith.constant 0 : index
    %c0_46 = arith.constant 0 : index
    %105 = vector.load %arg6[%c0_43, %c0_44, %c0_45, %c0_46] : memref<1x1x8x128xf32, #tpu.memory_space<vmem>>, vector<1x1x8x128xf32>
    %106 = vector.shape_cast %105 : vector<1x1x8x128xf32> to vector<8x128xf32>
    %107 = vector.shape_cast %104 : vector<8x128xf32> to vector<1x1x8x128xf32>
    tpu.vector_store %arg6[%c0_43, %c0_44, %c0_45, %c0_46], %107 {strides = array<i32>} : memref<1x1x8x128xf32, #tpu.memory_space<vmem>>, vector<1x1x8x128xf32>,
    return
  }
  func.func @transform_0(%arg0: i32, %arg1: i32, %arg2: i32) -> (i32, i32, i32) {
    %c1_i32 = arith.constant 1 : i32
    %0 = arith.muli %arg0, %c1_i32 : i32
    %1 = arith.addi %0, %arg2 : i32
    %c0_i32 = arith.constant 0 : i32
    %c0_i32_0 = arith.constant 0 : i32
    return %arg1, %1, %c0_i32 : i32, i32, i32
  }
  func.func @transform_1(%arg0: i32, %arg1: i32, %arg2: i32) -> (i32, i32, i32) {
    %c1_i32 = arith.constant 1 : i32
    %0 = arith.muli %arg0, %c1_i32 : i32
    %1 = arith.addi %0, %arg2 : i32
    %c0_i32 = arith.constant 0 : i32
    %c0_i32_0 = arith.constant 0 : i32
    return %arg1, %1, %c0_i32 : i32, i32, i32
  }
  func.func @transform_2(%arg0: i32, %arg1: i32, %arg2: i32) -> (i32, i32, i32) {
    %c1_i32 = arith.constant 1 : i32
    %0 = arith.muli %arg0, %c1_i32 : i32
    %1 = arith.addi %0, %arg2 : i32
    %c0_i32 = arith.constant 0 : i32
    %c0_i32_0 = arith.constant 0 : i32
    return %arg1, %1, %c0_i32 : i32, i32, i32
  }
  func.func @transform_3(%arg0: i32, %arg1: i32, %arg2: i32) -> (i32, i32, i32, i32) {
    %c0_i32 = arith.constant 0 : i32
    %c0_i32_0 = arith.constant 0 : i32
    %c0_i32_1 = arith.constant 0 : i32
    return %arg0, %arg1, %c0_i32, %c0_i32_0 : i32, i32, i32, i32
  }
}

</mosaic_0001>

<bundles_post_ra>
// kernel: tpu_custom_call.1
= control target key start
LH: loop header
LB: loop body
LE: loop exit
PB: predicated region body
PF: predicated region fallthrough
CT: control target
= control target key end

     0   :  { %s1024_s0 = inlined_call_operand.hbm [shape: f32[1,16,128], index: 0, kind: input, shape index: {}]   ;;  %s1025_s1 = inlined_call_operand.hbm [shape: f32[1,16,128], index: 1, kind: input, shape index: {}]   ;;  %s1026_s2 = inlined_call_operand.hbm [shape: f32[1,16,128], index: 2, kind: input, shape index: {}]   ;;  %s1027_s3 = inlined_call_operand.hbm [shape: f32[2,1,8,128], index: 3, kind: output, shape index: {}]  }
   0x1   :  { %1031 = sst [smem:[#allocation14_spill]] %s1025_s1 }
   0x2   :  { %8 = vsyncpa [#allocation3], 0 }
   0x3   :  { %10 = vsyncpa [#allocation3 + $0x1], 0 }
   0x4   :  { %11 = vsyncpa [#allocation6], 0 }
   0x5   :  { %13 = vsyncpa [#allocation6 + $0x1], 0 }
   0x6   :  { %14 = vsyncpa [#allocation4], 0 }
   0x7   :  { %16 = vsyncpa [#allocation4 + $0x1], 0  ;;  %s826_s12 = smov 0   ;;  %s828_s13 = smov 0  }
   0x8   :  { %s830_s14 = smov 0   ;;  %s832_s15 = smov 0  }
   0x9   :  { %s834_s16 = smov 0   ;;  %s836_s17 = smov 0  }
   0xa LB: > { %1032 = sst [smem:[#allocation12_spill]] %s796_s16  ;;  %s857_s18 = sadd.s32 4294967295, %s800_s17   ;;  %s800_s17 = sphi %s836_s17, %s22_s17   ;;  %s796_s16 = sphi %s834_s16, %s1044_s16   ;;  %s792_s15 = sphi %s832_s15, %s1043_s15   ;;  %s788_s14 = sphi %s830_s14, %s1047_s14   ;;  %s784_s13 = sphi %s828_s13, %s1046_s13   ;;  %s780_s12 = sphi %s826_s12, %s1045_s12  }
   0xb   : > { %s528_s19 = sadd.s32 4294967294, %s800_s17   ;;  %s41_s20 = sadd.s32 1, %s796_s16 }
   0xc   : > { %s52_s21 = sadd.s32 1, %s788_s14  ;;  %p43_p0 = scmp.ge.s32.totalorder %s41_s20, 2 }
   0xd   : > { %p59_p1 = scmp.ne.s32.totalorder %s788_s14, %s784_s13  ;;  %p60_p2 = scmp.eq.s32.totalorder %s800_s17, 0 }
   0xe   : > { %p65_p3 = scmp.ne.s32.totalorder %s784_s13, %s780_s12  ;;  %s1049_s20 = smov (%p43_p0, %s41_s20), 0 }
   0xf   : > { %1033 = sst [smem:[#allocation13_spill]] %s1049_s20  ;;  %p869_p4 = por %p60_p2, %p59_p1 }
  0x10   : > { %p66_p5 = scmp.eq.s32.totalorder %s857_s18, 0  ;;  %s48_s23 = ssub.s32 %s796_s16, %s1049_s20 }
  0x11   : > { %p151_p6 = scmp.eq.s32.totalorder %s857_s18, 1  ;;  %p50_p7 = scmp.eq.s32.totalorder %s48_s23, 0 }
  0x12   : > { %p877_p8 = por %p66_p5, %p65_p3  ;;  %p157_p10 = scmp.eq.s32.totalorder %s528_s19, 1 }
  0x13   : > { %p881_p9 = por %p151_p6, %p59_p1  ;;  %p569_p13 = scmp.lt.s32.totalorder %s800_s17, 2 }
  0x14   : > { %s886_s26 = scalar_select %p50_p7, %s788_s14, %s52_s21  }
  0x15   : > { %p888_p11 = por %p157_p10, %p65_p3  ;;  %s1028_s28 = sand.u32 1, %s788_s14  }
  0x16   : > { %s897_s29 = sshll.u32 %s1028_s28, 3  ;;  %s900_s30 = sshll.u32 %s796_s16, 7 }
  0x17   : > { %p904_p0 = pnand %p569_p13, %p869_p4  ;;  %s198_s5 = sand.u32 1, %s800_s17  }
  0x18   : > { %s1039_s1 = sld [smem:[#allocation14_spill]]  ;;  %s202_s9 = scalar_lea.vmem [#allocation5], %s897_s29 }
  0x19   : > { %s212_s10 = sshll.u32 %s202_s9, 4  ;;  %p537_p1 = scmp.ge.s32.totalorder %s800_s17, 1  ;;  %s213_s10 = int_to_ptr.vmem [resolvable:$true] %s212_s10 }
  0x1a   : > { %p238_p2 = scmp.lt.s32.totalorder %s800_s17, 3  ;;  %s916_s11 = scalar_lea.sflag [#allocation6], %s198_s5 }
  0x1b   : > { %p634_p3 = pneg %p904_p0  ;;  %s645_s19 = scalar_lea.vmem %s213_s10, 128 }
  0x1c   : > { %p646_p4 = scmp.ne.s32.totalorder %s213_s10, %s645_s19  ;;  %s802_s21 = smov [#allocation5]  }
  0x1d   : > { %s650_s22 = sshll.u32 %s802_s21, 4  ;;  %s651_s22 = int_to_ptr.vmem [resolvable:$false] %s650_s22 }
  0x1e   : > { %s210_s8 = scalar_lea.hbm %s1039_s1, %s900_s30  ;;  %p648_p5 = pnand %p646_p4, %p634_p3 }
  0x1f   : > { %s652_s23 = scalar_lea.vmem %s651_s22, 256  ;;  %p653_p7 = scmp.lt.s32.totalorder %s213_s10, %s651_s22 }
  0x20   : > { %p649_p6 = pneg %p648_p5  ;;  %p654_p10 = scmp.lt.s32.totalorder %s652_s23, %s645_s19 }
  0x22   : > { %p655_p13 = por %p654_p10, %p653_p7 }
  0x24   : > { %p656_p12 = pnand %p655_p13, %p649_p6 }
  0x26   : > { %659 = shalt.err (!%p656_p12)
}
  0x27   : > { %561 = dma.hbm_to_vmem [thread:$0]  (!%p904_p0), %s210_s8, 128, %s213_s10, %s916_s11  }
  0x28   : > { %p930_p4 = pnand %p537_p1, %p238_p2  ;;  %s189_s9 = scalar_lea.hbm %s1024_s0, %s900_s30 }
  0x29   : > { %s181_s19 = scalar_lea.vmem [#allocation2], %s897_s29  ;;  %s231_s28 = scalar_lea.hbm %s1026_s2, %s900_s30 }
  0x2a   : > { %s191_s21 = sshll.u32 %s181_s19, 4  ;;  %s1041_s1 = sand.u32 1, %s788_s14   ;;  %s192_s21 = int_to_ptr.vmem [resolvable:$true] %s191_s21 }
  0x2b   : > { %s178_s20 = scalar_lea.sflag [#allocation3], %s1041_s1  ;;  %s673_s8 = scalar_lea.vmem %s192_s21, 128 }
  0x2c   : > { %p674_p12 = scmp.ne.s32.totalorder %s192_s21, %s673_s8  ;;  %s803_s10 = smov [#allocation2]  }
  0x2d   : > { %s678_s16 = sshll.u32 %s803_s10, 4  ;;  %s679_s16 = int_to_ptr.vmem [resolvable:$false] %s678_s16 }
  0x2e   : > { %p676_p1 = pnand %p674_p12, %p634_p3  ;;  %s680_s6 = scalar_lea.vmem %s679_s16, 256 }
  0x2f   : > { %p681_p5 = scmp.lt.s32.totalorder %s192_s21, %s679_s16  ;;  %p682_p6 = scmp.lt.s32.totalorder %s680_s6, %s673_s8 }
  0x30   : > { %p677_p2 = pneg %p676_p1 }
  0x31   : > { %p683_p7 = por %p682_p6, %p681_p5 }
  0x33   : > { %p684_p10 = pnand %p683_p7, %p677_p2 }
  0x35   : > { %687 = shalt.err (!%p684_p10)
}
  0x36   : > { %558 = dma.hbm_to_vmem [thread:$0]  (!%p904_p0), %s189_s9, 128, %s192_s21, %s178_s20  }
  0x37   : > { %s223_s1 = scalar_lea.vmem [#allocation7], %s897_s29  ;;  %s804_s22 = smov [#allocation7]  }
  0x38   : > { %s233_s7 = sshll.u32 %s223_s1, 4  ;;  %s706_s16 = sshll.u32 %s804_s22, 4  ;;  %s234_s7 = int_to_ptr.vmem [resolvable:$true] %s233_s7  ;;  %s707_s16 = int_to_ptr.vmem [resolvable:$false] %s706_s16 }
  0x39   : > { %s701_s19 = scalar_lea.vmem %s234_s7, 128  ;;  %s708_s23 = scalar_lea.vmem %s707_s16, 256 }
  0x3a   : > { %p702_p13 = scmp.ne.s32.totalorder %s234_s7, %s701_s19  ;;  %p709_p2 = scmp.lt.s32.totalorder %s234_s7, %s707_s16 }
  0x3b   : > { %p710_p5 = scmp.lt.s32.totalorder %s708_s23, %s701_s19 }
  0x3c   : > { %p704_p12 = pnand %p702_p13, %p634_p3 }
  0x3d   : > { %p711_p6 = por %p710_p5, %p709_p2 }
  0x3e   : > { %p705_p1 = pneg %p704_p12 }
  0x40   : > { %p712_p7 = pnand %p711_p6, %p705_p1 }
  0x42   : > { %715 = shalt.err (!%p712_p7)
}
  0x43   : > { %564 = dma.hbm_to_vmem [thread:$0]  (!%p904_p0), %s231_s28, 128, %s234_s7, %s916_s11  }
  0x44   : > { %242 = sbr.rel (%p930_p4) target bundleno = 191 (0xbf), region = 32  ;;  %s965_s9 = sand.u32 (!%p930_p4), 1, %s784_s13  }
  0x45   : > { %s968_s21 = sshll.u32 (!%p930_p4), %s965_s9, 3  ;;  %s245_s4 = scalar_lea.sflag (!%p930_p4), [#allocation3], %s965_s9 }
  0x46   : > { %s248_s8 = scalar_lea.vmem (!%p930_p4), [#allocation2], %s968_s21 }
  0x49   : > { %767 = dma.done.wait (%p877_p8), %s245_s4, 128  }
  0x4a   : > { %769 = vsyncadd (%p877_p8), %s245_s4, 4294967168  ;;  %s253_s28 = sand.u32 1, %s857_s18   ;;  %s257_s11 = scalar_lea.vmem [#allocation5], %s968_s21 }
  0x4b   : > { %s254_s30 = scalar_lea.sflag [#allocation6], %s253_s28 }
  0x4c   : > { %771 = dma.done.wait (%p877_p8), %s254_s30, 256  }
  0x4d   : > { %773 = vsyncadd (%p877_p8), %s254_s30, 4294967040  ;;  %s266_s5 = scalar_lea.vmem [#allocation7], %s968_s21  ;;  %v308_v3 = vld [vmem:[%s257_s11] sm:$0xff]  ;;  %v307_v5 = vld [vmem:[%s248_s8] sm:$0xff]  ;;  %s544_s18 = sshll.u32 %s792_s15, 7 }
  0x4e   : > { %v309_v0 = vld [vmem:[%s266_s5] sm:$0xff]  ;;  %v542_v4 = vclamps-f32 %v308_v3, 4.0  ;;  %s298_s24 = scalar_lea.vmem [#allocation8], %s968_s21  ;;  %s391_s7 = scalar_lea.hbm %s1027_s3, %s544_s18 }
  0x4f   : > { %v312_v1 = vmax.f32 %v309_v0, 0.11  ;;  %s393_s10 = sshll.u32 %s298_s24, 4  ;;  %s379_s19 = scalar_lea.sflag [#allocation4], %s965_s9  ;;  %s394_s10 = int_to_ptr.vmem [resolvable:$true] %s393_s10 }
  0x50   : > { %v319_v6 = vsub.f32 %v307_v5, %v542_v4  ;;  %s716_s22 = scalar_lea.vmem %s394_s10, 128  ;;  %s805_s16 = smov [#allocation8]  }
  0x51   : > { %v313_v2 = vmin.f32 %v312_v1, 16.0  ;;  %p717_p8 = scmp.ne.s32.totalorder %s394_s10, %s716_s22  ;;  %s720_s23 = sshll.u32 %s805_s16, 4  ;;  %s721_s23 = int_to_ptr.vmem [resolvable:$false] %s720_s23 }
  0x52   : > { %v320_v9 = vand.u32 2147483647, %v319_v6  ;;  %s722_s20 = scalar_lea.vmem %s721_s23, 256  ;;  %p723_p4 = scmp.lt.s32.totalorder %s394_s10, %s721_s23 }
  0x53   : > { %620 = vrcp.f32 %v313_v2  ;;  %p718_p0 = pnand %p717_p8, %p881_p9  ;;  %p724_p10 = scmp.lt.s32.totalorder %s722_s20, %s716_s22 }
  0x54   : > { %v321_v12 = vsub.f32 0.5, %v320_v9  ;;  %v323_v13 = vadd.f32 0.5, %v320_v9 }
  0x55   : > { %p719_p3 = pneg %p718_p0  ;;  %p725_p13 = por %p724_p10, %p723_p4 }
  0x57   : > { %p726_p12 = pnand %p725_p13, %p719_p3 }
  0x60   : > { %v621_v7 = vpop.eup %620 }
  0x61   : > { %v315_v8 = vmul.f32 %v621_v7, %v313_v2 }
  0x63   : > { %v316_v10 = vsub.f32 2.0, %v315_v8 }
  0x65   : > { %v317_v11 = vmul.f32 %v621_v7, %v316_v10 }
  0x67   : > { %v318_v14 = vmul.f32 0.70710677, %v317_v11 }
  0x69   : > { %v322_v15 = vmul.f32 %v321_v12, %v318_v14  ;;  %v324_v16 = vmul.f32 %v323_v13, %v318_v14 }
  0x6b   : > { %v325_v17 = vand.u32 2147483647, %v322_v15  ;;  %v346_v18 = vmul.f32 0.3275911, %v324_v16  ;;  %v361_v24 = vsub.f32 0.0, %v324_v16  ;;  %vm366_vm0 = vcmp.ge.f32.partialorder %v322_v15, 0.0 }
  0x6d   : > { %v326_v19 = vmul.f32 0.3275911, %v325_v17  ;;  %v347_v20 = vadd.f32 1.0, %v346_v18  ;;  %v341_v22 = vsub.f32 0.0, %v325_v17  ;;  %v362_v30 = vmul.f32 %v361_v24, %v324_v16 }
  0x6f   : > { %v327_v21 = vadd.f32 1.0, %v326_v19  ;;  %622 = vrcp.f32 %v347_v20  ;;  %v342_v28 = vmul.f32 %v341_v22, %v325_v17  ;;  %v363_v36 = vmul.f32 1.442695, %v362_v30 }
  0x71   : > { %624 = vrcp.f32 %v327_v21  ;;  %v343_v34 = vmul.f32 1.442695, %v342_v28 }
  0x73   : > { %626 = vpow2.f32 %v343_v34 }
  0x74   : > { %628 = vpow2.f32 %v363_v36 }
  0x7c   : > { %v623_v23 = vpop.eup %622 }
  0x7d   : > { %v349_v25 = vmul.f32 %v623_v23, %v347_v20 }
  0x7e   : > { %v625_v26 = vpop.eup %624 }
  0x7f   : > { %v329_v27 = vmul.f32 %v625_v26, %v327_v21  ;;  %v350_v29 = vsub.f32 2.0, %v349_v25 }
  0x80   : > { %v627_v52 = vpop.eup %626 }
  0x81   : > { %v330_v31 = vsub.f32 2.0, %v329_v27  ;;  %v351_v32 = vmul.f32 %v623_v23, %v350_v29  ;;  %v629_v54 = vpop.eup %628 }
  0x83   : > { %v331_v33 = vmul.f32 %v625_v26, %v330_v31  ;;  %v352_v35 = vmul.f32 1.0614054, %v351_v32 }
  0x85   : > { %v332_v37 = vmul.f32 1.0614054, %v331_v33  ;;  %v353_v38 = vadd.f32 -1.4531521, %v352_v35 }
  0x87   : > { %v333_v39 = vadd.f32 -1.4531521, %v332_v37  ;;  %v354_v40 = vmul.f32 %v353_v38, %v351_v32 }
  0x89   : > { %v334_v41 = vmul.f32 %v333_v39, %v331_v33  ;;  %v355_v42 = vadd.f32 1.4214138, %v354_v40 }
  0x8b   : > { %v335_v43 = vadd.f32 1.4214138, %v334_v41  ;;  %v356_v44 = vmul.f32 %v355_v42, %v351_v32 }
  0x8d   : > { %v336_v45 = vmul.f32 %v335_v43, %v331_v33  ;;  %v357_v46 = vadd.f32 -0.28449672, %v356_v44 }
  0x8f   : > { %v337_v47 = vadd.f32 -0.28449672, %v336_v45  ;;  %v358_v48 = vmul.f32 %v357_v46, %v351_v32 }
  0x91   : > { %v338_v49 = vmul.f32 %v337_v47, %v331_v33  ;;  %v359_v50 = vadd.f32 0.2548296, %v358_v48 }
  0x93   : > { %v339_v51 = vadd.f32 0.2548296, %v338_v49  ;;  %v360_v53 = vmul.f32 %v359_v50, %v351_v32 }
  0x95   : > { %v340_v55 = vmul.f32 %v339_v51, %v331_v33  ;;  %v365_v57 = vmul.f32 %v629_v54, %v360_v53 }
  0x97   : > { %v345_v56 = vmul.f32 %v627_v52, %v340_v55 }
  0x99   : > { %v367_v58 = vsub.f32 2.0, %v345_v56 }
  0x9b   : > { %v368_v59 = vsel %vm366_vm0, %v367_v58, %v345_v56 }
  0x9c   : > { %v369_v60 = vsub.f32 %v368_v59, %v365_v57 }
  0x9e   : > { %v370_v61 = vmul.f32 0.5, %v369_v60 }
  0xa0   : > { %v371_v62 = vmax.f32 %v370_v61, 1e-09 }
  0xa2   : > { %630 = vlog2.f32 %v371_v62 }
  0xaf   : > { %v631_v63 = vpop.eup %630 }
  0xb0   : > { %v373_v0 = vmul.f32 0.6931472, %v631_v63 }
  0xb2   : > { %377 = vst [vmem:[%s298_s24] sm:$0xff] %v373_v0 }
  0xb3   : > { %729 = shalt.err (!%p726_p12)
}
  0xb4   : > { %s730_s15 = scalar_lea.hbm %s391_s7, 128  ;;  %s734_s21 = scalar_lea.hbm %s1027_s3, 256 }
  0xb5   : > { %p731_p1 = scmp.ne.s32.totalorder %s391_s7, %s730_s15  ;;  %p735_p6 = scmp.lt.s32.totalorder %s391_s7, %s1027_s3 }
  0xb6   : > { %p736_p7 = scmp.lt.s32.totalorder %s734_s21, %s730_s15 }
  0xb7   : > { %p732_p2 = pnand %p731_p1, %p881_p9 }
  0xb8   : > { %p737_p8 = por %p736_p7, %p735_p6 }
  0xb9   : > { %p733_p5 = pneg %p732_p2 }
  0xbb   : > { %p738_p0 = pnand %p737_p8, %p733_p5 }
  0xbd   : > { %741 = shalt.err (!%p738_p0)
}
  0xbe   : > { %553 = dma.vmem_to_hbm [thread:$0]  (%p881_p9), %s394_s10, 128, %s391_s7, %s379_s19  }
  0xbf PF: > { %s405_s28 = sand.u32 1, %s780_s12   ;;  %p1042_p3 = scmp.ge.s32.totalorder %s800_s17, 2 }
  0xc0   : > { %s406_s30 = scalar_lea.sflag [#allocation4], %s405_s28 }
  0xc1   : > { %p566_p4 = pnand %p1042_p3, %p888_p11 }
  0xc3   : > { %p567_p10 = pneg %p566_p4 }
  0xc5   : > { %775 = dma.done.wait (%p567_p10), %s406_s30, 128  }
  0xc6   : > { %777 = vsyncadd (%p567_p10), %s406_s30, 4294967168  ;;  %s22_s17 = sadd.s32 1, %s800_s17   ;;  %s1043_s15 = sld [smem:[#allocation12_spill]] }
  0xc7   : > { %p19_p13 = scmp.ge.s32.totalorder %s22_s17, 4   ;;  %s1044_s16 = sld [smem:[#allocation13_spill]] }
  0xc8   : > { %s1045_s12 = smov %s784_s13  ;;  %s1046_s13 = smov %s788_s14 }
  0xc9   : > { %s1047_s14 = smov %s886_s26  ;;  %21 = sbr.rel (!%p19_p13) target bundleno = 10 (0xa), region = 105 }
  0xce   :  { %411 = vsyncpa [#allocation3], 1 }
  0xcf   :  { %413 = vsyncpa [#allocation3 + $0x1], 1 }
  0xd0   :  { %414 = vsyncpa [#allocation6], 1 }
  0xd1   :  { %416 = vsyncpa [#allocation6 + $0x1], 1 }
  0xd2   :  { %417 = vsyncpa [#allocation4], 1 }
  0xd3   :  { %419 = vsyncpa [#allocation4 + $0x1], 1 }

</bundles_post_ra>
